<compile_context>
chip_gen: v5e
topology: v5e:2x2
jax: 0.10.0
libtpu: 0.0.40
codegen_flags: <defaults>
</compile_context>

<pallas_src>
import math

import jax
import jax.numpy as jnp
from jax import lax
from jax.experimental import pallas as pl
from jax.experimental.pallas import tpu as pltpu

LN_EPS = 1e-12            # FusedLayerNorm eps used in UNITER BERT heads
INV_SQRT2 = 1.0 / math.sqrt(2.0)
LANE = 128                # TPU vreg lane width
SUBLANE = 8


def _round_up(x, m):
    return ((x + m - 1) // m) * m


def _make_kernel(inv_h):
    """Build the kernel; inv_h = 1 / true hidden size (padded lanes are 0)."""

    def kernel(x_ref, w1_ref, b1_ref, wdec_ref, bdec_ref, out_ref):
        # x_ref:    (tm, Hpad)     token tile (activation dtype)
        # w1_ref:   (Hpad, Hpad)   dense weight, (in, out) layout (act dtype)
        # b1_ref:   (1, Hpad)      dense bias (f32, zero in padded lanes)
        # wdec_ref: (Hpad, Ppad)   decoder weight^T with LN gamma folded (act dtype)
        # bdec_ref: (1, Ppad)      decoder bias with LN beta folded (f32)
        # out_ref:  (tm, Ppad)

        # Dense (hidden -> hidden): MXU consumes the activation dtype,
        # accumulates in f32.
        h = jnp.dot(x_ref[...], w1_ref[...], preferred_element_type=jnp.float32)
        h = h + b1_ref[...]

        # Exact GELU: x * 0.5 * (1 + erf(x / sqrt(2)))
        # TODO(synk): if bundle dumps show the VALU saturating on v6e/v7x,
        # switch to tanh-approx GELU so the transcendental lands on the EUP.
        h = 0.5 * h * (1.0 + lax.erf(h * INV_SQRT2))

        # LayerNorm over the *true* hidden dim.  Padded hidden lanes of h are
        # exactly zero, so plain sums divided by the true H are exact.
        # One-pass variance, clamped against f32 cancellation going negative.
        mu = jnp.sum(h, axis=-1, keepdims=True) * inv_h
        var = jnp.sum(h * h, axis=-1, keepdims=True) * inv_h - mu * mu
        var = jnp.maximum(var, 0.0)
        n = (h - mu) * lax.rsqrt(var + LN_EPS)

        # Decoder with the LN affine already folded into wdec/bdec (prep time).
        # Feed the MXU in the activation dtype (single-pass bf16 on v6e/v7x);
        # padded hidden rows of wdec are zero so they contribute nothing.
        logits = jnp.dot(n.astype(wdec_ref.dtype), wdec_ref[...],
                         preferred_element_type=jnp.float32)
        out_ref[...] = (logits + bdec_ref[...]).astype(out_ref.dtype)

    return kernel


def prepare_polarity_head_params(params, *, act_dtype=jnp.float32):
    """One-time (model-load-time) parameter preparation.

    * transposes the dense weight to (in, out) layout
    * folds the LayerNorm affine into the decoder weight / bias (in f32):
        (n*gamma + beta) @ Wd^T + b  ==  n @ (gamma[:,None]*Wd^T) + (beta@Wd^T + b)
    * pads the hidden dim / class dim up to 128-lane multiples
    * stores matmul operands in the activation dtype (f32 accumulation in-kernel)
    """
    dense_w = params["dense_w"]                      # (H, H), PyTorch (out, in)
    H = dense_w.shape[0]
    emb = params["polarity_embedding"]               # (P, H)
    P = emb.shape[0]

    gamma = params["ln_gamma"].astype(jnp.float32)
    beta = params["ln_beta"].astype(jnp.float32)
    wdec_t = emb.T.astype(jnp.float32)               # (H, P)
    wdec_eff = gamma[:, None] * wdec_t               # (H, P)
    bdec_eff = beta @ wdec_t + params["decoder_b"].astype(jnp.float32)   # (P,)

    H_pad = _round_up(H, LANE)
    P_pad = _round_up(P, LANE)

    w1_t = dense_w.T.astype(act_dtype)               # (H, H) in (in, out) layout
    b1 = params["dense_b"].astype(jnp.float32)

    if H_pad != H:
        w1_t = jnp.pad(w1_t, ((0, H_pad - H), (0, H_pad - H)))
        b1 = jnp.pad(b1, (0, H_pad - H))
        wdec_eff = jnp.pad(wdec_eff, ((0, H_pad - H), (0, 0)))
    if P_pad != P:
        wdec_eff = jnp.pad(wdec_eff, ((0, 0), (0, P_pad - P)))
        bdec_eff = jnp.pad(bdec_eff, (0, P_pad - P))

    return {
        "w1_t": w1_t,                                        # (Hpad, Hpad)
        "b1": b1.reshape(1, H_pad),                          # (1, Hpad) f32
        "wdec_eff": wdec_eff.astype(act_dtype),              # (Hpad, Ppad)
        "bdec_eff": bdec_eff.reshape(1, P_pad).astype(jnp.float32),
        "H": H, "H_pad": H_pad, "P": P, "P_pad": P_pad,
        "act_dtype": act_dtype,
    }


def bert_polarity_head(hidden_states, prep, *, tm=512):
    """hidden_states: (B, S, H) -> logits: (B, S, P). `prep` from prepare_*()."""
    B, S, H = hidden_states.shape
    assert H == prep["H"], "hidden size mismatch with prepared params"
    H_pad, P, P_pad = prep["H_pad"], prep["P"], prep["P_pad"]
    N = B * S

    # Balanced row tile: big enough to amortize the ~0.35 us per-grid-step
    # overhead, but sized to the actual token count so padding waste stays small.
    n_tiles = max(1, pl.cdiv(N, tm))
    tm_eff = max(SUBLANE, _round_up(pl.cdiv(N, n_tiles), SUBLANE))
    grid = (pl.cdiv(N, tm_eff),)
    n_pad = grid[0] * tm_eff

    x2d = hidden_states.reshape(N, H).astype(prep["act_dtype"])
    if n_pad != N or H_pad != H:
        x2d = jnp.pad(x2d, ((0, n_pad - N), (0, H_pad - H)))

    act_bytes = jnp.dtype(prep["act_dtype"]).itemsize
    out_bytes = jnp.dtype(hidden_states.dtype).itemsize

    # VMEM working set: x/out double-buffered, constant weights single-buffered,
    # plus generous f32 scratch headroom for the GELU / LayerNorm temporaries.
    # TODO(synk): if H grows so that the resident weights approach ~48 MiB
    # (possible on v7x's 64 MiB VMEM), add a K-tiled ("arbitrary") grid axis.
    need = (2 * tm_eff * H_pad * act_bytes          # x tiles (double-buffered)
            + 2 * tm_eff * P_pad * out_bytes        # out tiles
            + H_pad * H_pad * act_bytes             # dense weight (single buf)
            + H_pad * P_pad * act_bytes             # decoder weight (single buf)
            + (H_pad + P_pad) * 4                   # biases
            + 4 * tm_eff * H_pad * 4)               # f32 temporaries
    vmem_limit = int(min(max(1.5 * need, 32 << 20), 64 << 20))

    cost = pl.CostEstimate(
        flops=2 * n_pad * H_pad * H_pad + 2 * n_pad * H_pad * P_pad,
        transcendentals=n_pad * H_pad,
        bytes_accessed=(n_pad * H_pad * act_bytes
                        + H_pad * H_pad * act_bytes
                        + H_pad * P_pad * act_bytes
                        + n_pad * P_pad * out_bytes),
    )

    # Constant operands: index_map is constant, so single-buffer them.
    const = dict(pipeline_mode=pl.Buffered(1))

    out2d = pl.pallas_call(
        _make_kernel(1.0 / H),
        out_shape=jax.ShapeDtypeStruct((n_pad, P_pad), hidden_states.dtype),
        grid_spec=pltpu.PrefetchScalarGridSpec(
            num_scalar_prefetch=0,
            grid=grid,
            in_specs=[
                pl.BlockSpec((tm_eff, H_pad), lambda i: (i, 0)),          # x
                pl.BlockSpec((H_pad, H_pad), lambda i: (0, 0), **const),  # W1^T
                pl.BlockSpec((1, H_pad), lambda i: (0, 0), **const),      # b1
                pl.BlockSpec((H_pad, P_pad), lambda i: (0, 0), **const),  # Wdec
                pl.BlockSpec((1, P_pad), lambda i: (0, 0), **const),      # bdec
            ],
            out_specs=pl.BlockSpec((tm_eff, P_pad), lambda i: (i, 0)),
        ),
        compiler_params=pltpu.CompilerParams(
            dimension_semantics=("parallel",),
            vmem_limit_bytes=vmem_limit),
        cost_estimate=cost,
    )(x2d, prep["w1_t"], prep["b1"], prep["wdec_eff"], prep["bdec_eff"])

    return out2d[:N, :P].reshape(B, S, P)


def _reference(hidden_states, params):
    """Plain-JAX reference of the PyTorch forward for verification."""
    h = hidden_states @ params["dense_w"].T + params["dense_b"]
    h = 0.5 * h * (1.0 + lax.erf(h * INV_SQRT2))
    mu = jnp.mean(h, axis=-1, keepdims=True)
    var = jnp.mean((h - mu) ** 2, axis=-1, keepdims=True)
    h = (h - mu) / jnp.sqrt(var + LN_EPS)
    h = h * params["ln_gamma"] + params["ln_beta"]
    return h @ params["polarity_embedding"].T + params["decoder_b"]


def _make_params(key, H, P):
    k_w1, k_b1, k_emb = jax.random.split(key, 3)
    return {
        # BertPredictionHeadTransform: Linear(H, H) + gelu + LayerNorm(H)
        "dense_w": 0.02 * jax.random.normal(k_w1, (H, H), dtype=jnp.float32),
        "dense_b": 0.01 * jax.random.normal(k_b1, (H,), dtype=jnp.float32),
        "ln_gamma": jnp.ones((H,), dtype=jnp.float32),
        "ln_beta": jnp.zeros((H,), dtype=jnp.float32),
        # decoder.weight = polarity_embedding, shape (P, H); bias init zeros
        "polarity_embedding": 0.02 * jax.random.normal(k_emb, (P, H),
                                                       dtype=jnp.float32),
        "decoder_b": jnp.zeros((P,), dtype=jnp.float32),
    }


if __name__ == "__main__":
    H, P = 32, 8   # hidden, num_polarity_classes (small test shapes)

    key = jax.random.PRNGKey(0)
    k_params, k_x1, k_x2 = jax.random.split(key, 3)
    params = _make_params(k_params, H, P)

    # Parameter prep happens once (model-load time), not per forward call.
    prep = prepare_polarity_head_params(params, act_dtype=jnp.float32)

    # Case 1: nicely shaped batch (B=2, S=8).
    x1 = jax.random.normal(k_x1, (2, 8, H), dtype=jnp.float32)
    out1 = jax.block_until_ready(bert_polarity_head(x1, prep))
    ref1 = _reference(x1, params)
    assert out1.shape == (2, 8, P)
    assert jnp.allclose(out1, ref1, atol=1e-4, rtol=1e-4), "mismatch (case 1)"

    # Case 2: token count not divisible by the tile (exercises padding path).
    x2 = jax.random.normal(k_x2, (3, 5, H), dtype=jnp.float32)
    out2 = jax.block_until_ready(bert_polarity_head(x2, prep))
    ref2 = _reference(x2, params)
    assert out2.shape == (3, 5, P)
    assert jnp.allclose(out2, ref2, atol=1e-4, rtol=1e-4), "mismatch (case 2)"

    print("KERNEL_OK")
</pallas_src>

<mosaic_0001>
module attributes {stable_mosaic.version = 11 : i64} {
  func.func @kernel(%arg0: i32, %arg1: memref<16x128xf32, #tpu.memory_space<vmem>>, %arg2: memref<128x128xf32, #tpu.memory_space<vmem>>, %arg3: memref<1x128xf32, #tpu.memory_space<vmem>>, %arg4: memref<128x128xf32, #tpu.memory_space<vmem>>, %arg5: memref<1x128xf32, #tpu.memory_space<vmem>>, %arg6: memref<16x128xf32, #tpu.memory_space<vmem>>) attributes {dimension_semantics = [#tpu.dimension_semantics<parallel>], iteration_bounds = array<i64: 1>, scalar_prefetch = 0 : i64, scratch_operands = 0 : i64, tpu.core_type = #tpu.core_type<tc>, window_params = [{transform_indices = @transform_0, window_bounds = array<i64: 16, 128>}, {pipeline_mode = #tpu.pipeline_mode<synchronous>, transform_indices = @transform_1, window_bounds = array<i64: 128, 128>}, {pipeline_mode = #tpu.pipeline_mode<synchronous>, transform_indices = @transform_2, window_bounds = array<i64: 1, 128>}, {pipeline_mode = #tpu.pipeline_mode<synchronous>, transform_indices = @transform_3, window_bounds = array<i64: 128, 128>}, {pipeline_mode = #tpu.pipeline_mode<synchronous>, transform_indices = @transform_4, window_bounds = array<i64: 1, 128>}, {transform_indices = @transform_5, window_bounds = array<i64: 16, 128>}]} {
    %c0 = arith.constant 0 : index
    %c0_0 = arith.constant 0 : index
    %0 = vector.load %arg1[%c0, %c0_0] : memref<16x128xf32, #tpu.memory_space<vmem>>, vector<16x128xf32>
    %c0_1 = arith.constant 0 : index
    %c0_2 = arith.constant 0 : index
    %1 = vector.load %arg2[%c0_1, %c0_2] : memref<128x128xf32, #tpu.memory_space<vmem>>, vector<128x128xf32>
    %cst = arith.constant dense<0.000000e+00> : vector<16x128xf32>
    %2 = tpu.matmul %0, %1, %cst {dimension_numbers = #tpu.dot_dimension_numbers<[1], [0], [0], [1], [0, 0, 1, 1], [], []>} : vector<16x128xf32>, vector<128x128xf32>, vector<16x128xf32> -> vector<16x128xf32>
    %c0_3 = arith.constant 0 : index
    %c0_4 = arith.constant 0 : index
    %3 = vector.load %arg3[%c0_3, %c0_4] : memref<1x128xf32, #tpu.memory_space<vmem>>, vector<1x128xf32>
    %4 = vector.broadcast %3 : vector<1x128xf32> to vector<16x128xf32>
    %5 = arith.addf %2, %4 : vector<16x128xf32>
    %cst_5 = arith.constant 5.000000e-01 : f32
    %6 = vector.broadcast %cst_5 : f32 to vector<16x128xf32>
    %7 = arith.mulf %6, %5 : vector<16x128xf32>
    %cst_6 = arith.constant 0.707106769 : f32
    %8 = vector.broadcast %cst_6 : f32 to vector<16x128xf32>
    %9 = arith.mulf %5, %8 : vector<16x128xf32>
    %10 = math.erf %9 : vector<16x128xf32>
    %cst_7 = arith.constant 1.000000e+00 : f32
    %11 = vector.broadcast %cst_7 : f32 to vector<16x128xf32>
    %12 = arith.addf %11, %10 : vector<16x128xf32>
    %13 = arith.mulf %7, %12 : vector<16x128xf32>
    %cst_8 = arith.constant dense<0.000000e+00> : vector<16xf32>
    %14 = vector.multi_reduction <add>, %13, %cst_8 [1] : vector<16x128xf32> to vector<16xf32>
    %15 = vector.shape_cast %14 : vector<16xf32> to vector<16x1xf32>
    %cst_9 = arith.constant 3.125000e-02 : f32
    %16 = vector.broadcast %cst_9 : f32 to vector<16x1xf32>
    %17 = arith.mulf %15, %16 : vector<16x1xf32>
    %18 = arith.mulf %13, %13 : vector<16x128xf32>
    %cst_10 = arith.constant dense<0.000000e+00> : vector<16xf32>
    %19 = vector.multi_reduction <add>, %18, %cst_10 [1] : vector<16x128xf32> to vector<16xf32>
    %20 = vector.shape_cast %19 : vector<16xf32> to vector<16x1xf32>
    %cst_11 = arith.constant 3.125000e-02 : f32
    %21 = vector.broadcast %cst_11 : f32 to vector<16x1xf32>
    %22 = arith.mulf %20, %21 : vector<16x1xf32>
    %23 = arith.mulf %17, %17 : vector<16x1xf32>
    %24 = arith.subf %22, %23 : vector<16x1xf32>
    %cst_12 = arith.constant 0.000000e+00 : f32
    %25 = vector.broadcast %cst_12 : f32 to vector<16x1xf32>
    %26 = arith.maximumf %24, %25 : vector<16x1xf32>
    %27 = vector.broadcast %17 : vector<16x1xf32> to vector<16x128xf32>
    %28 = arith.subf %13, %27 : vector<16x128xf32>
    %cst_13 = arith.constant 9.99999996E-13 : f32
    %29 = vector.broadcast %cst_13 : f32 to vector<16x1xf32>
    %30 = arith.addf %26, %29 : vector<16x1xf32>
    %31 = math.rsqrt %30 : vector<16x1xf32>
    %32 = vector.broadcast %31 : vector<16x1xf32> to vector<16x128xf32>
    %33 = arith.mulf %28, %32 : vector<16x128xf32>
    %c0_14 = arith.constant 0 : index
    %c0_15 = arith.constant 0 : index
    %34 = vector.load %arg4[%c0_14, %c0_15] : memref<128x128xf32, #tpu.memory_space<vmem>>, vector<128x128xf32>
    %cst_16 = arith.constant dense<0.000000e+00> : vector<16x128xf32>
    %35 = tpu.matmul %33, %34, %cst_16 {dimension_numbers = #tpu.dot_dimension_numbers<[1], [0], [0], [1], [0, 0, 1, 1], [], []>} : vector<16x128xf32>, vector<128x128xf32>, vector<16x128xf32> -> vector<16x128xf32>
    %c0_17 = arith.constant 0 : index
    %c0_18 = arith.constant 0 : index
    %36 = vector.load %arg5[%c0_17, %c0_18] : memref<1x128xf32, #tpu.memory_space<vmem>>, vector<1x128xf32>
    %37 = vector.broadcast %36 : vector<1x128xf32> to vector<16x128xf32>
    %38 = arith.addf %35, %37 : vector<16x128xf32>
    %c0_19 = arith.constant 0 : index
    %c0_20 = arith.constant 0 : index
    %39 = vector.load %arg6[%c0_19, %c0_20] : memref<16x128xf32, #tpu.memory_space<vmem>>, vector<16x128xf32>
    tpu.vector_store %arg6[%c0_19, %c0_20], %38 {strides = array<i32>} : memref<16x128xf32, #tpu.memory_space<vmem>>, vector<16x128xf32>,
    return
  }
  func.func @transform_0(%arg0: i32) -> (i32, i32) {
    %c0_i32 = arith.constant 0 : i32
    %c0_i32_0 = arith.constant 0 : i32
    return %arg0, %c0_i32 : i32, i32
  }
  func.func @transform_1(%arg0: i32) -> (i32, i32) {
    %c0_i32 = arith.constant 0 : i32
    %c0_i32_0 = arith.constant 0 : i32
    %c0_i32_1 = arith.constant 0 : i32
    return %c0_i32, %c0_i32_0 : i32, i32
  }
  func.func @transform_2(%arg0: i32) -> (i32, i32) {
    %c0_i32 = arith.constant 0 : i32
    %c0_i32_0 = arith.constant 0 : i32
    %c0_i32_1 = arith.constant 0 : i32
    return %c0_i32, %c0_i32_0 : i32, i32
  }
  func.func @transform_3(%arg0: i32) -> (i32, i32) {
    %c0_i32 = arith.constant 0 : i32
    %c0_i32_0 = arith.constant 0 : i32
    %c0_i32_1 = arith.constant 0 : i32
    return %c0_i32, %c0_i32_0 : i32, i32
  }
  func.func @transform_4(%arg0: i32) -> (i32, i32) {
    %c0_i32 = arith.constant 0 : i32
    %c0_i32_0 = arith.constant 0 : i32
    %c0_i32_1 = arith.constant 0 : i32
    return %c0_i32, %c0_i32_0 : i32, i32
  }
  func.func @transform_5(%arg0: i32) -> (i32, i32) {
    %c0_i32 = arith.constant 0 : i32
    %c0_i32_0 = arith.constant 0 : i32
    return %arg0, %c0_i32 : i32, i32
  }
}

</mosaic_0001>

<bundles_post_ra>
// kernel: tpu_custom_call.1
= control target key start
LH: loop header
LB: loop body
LE: loop exit
PB: predicated region body
PF: predicated region fallthrough
CT: control target
= control target key end

     0   :  { %10 = vsyncpa [#allocation3], 0  ;;  %s555_s0 = inlined_call_operand.hbm [shape: f32[16,128], index: 0, kind: input, shape index: {}]   ;;  %s556_s1 = inlined_call_operand.hbm [shape: f32[128,128], index: 1, kind: input, shape index: {}]   ;;  %s557_s2 = inlined_call_operand.vmem [shape: f32[1,128], index: 2, kind: input, shape index: {}]   ;;  %s558_s3 = inlined_call_operand.hbm [shape: f32[128,128], index: 3, kind: input, shape index: {}]   ;;  %s559_s4 = inlined_call_operand.vmem [shape: f32[1,128], index: 4, kind: input, shape index: {}]   ;;  %s560_s5 = inlined_call_operand.hbm [shape: f32[16,128], index: 5, kind: output, shape index: {}]  }
   0x1   :  { %11 = vsyncpa [#allocation6], 0 }
   0x2   :  { %12 = vsyncpa [#allocation4], 0  ;;  %s30_s20 = sshll.u32 %s556_s1, 4  ;;  %s464_s21 = smov [#allocation5]   ;;  %s31_s20 = int_to_ptr.hbm [resolvable:$true] %s30_s20 }
   0x3   :  { %s32_s22 = sshll.u32 %s464_s21, 4  ;;  %s17_s25 = sshll.u32 %s555_s0, 4  ;;  %s33_s22 = int_to_ptr.vmem [resolvable:$true] %s32_s22  ;;  %s18_s25 = int_to_ptr.hbm [resolvable:$true] %s17_s25 }
   0x4   :  { %s465_s26 = smov 128   ;;  %s466_s27 = smov 8  }
   0x5   :  { %38 = dma.hbm_to_vmem [thread:$0]  %s31_s20, 2048, %s33_s22, [#allocation6], %s465_s26, %s465_s26, %s466_s27  }
   0x6   :  { %s467_s28 = smov [#allocation2]   ;;  %s45_s1 = sshll.u32 %s558_s3, 4  ;;  %s46_s1 = int_to_ptr.hbm [resolvable:$true] %s45_s1 }
   0x7   :  { %s19_s29 = sshll.u32 %s467_s28, 4  ;;  %s468_s0 = smov [#allocation7]   ;;  %s20_s29 = int_to_ptr.vmem [resolvable:$true] %s19_s29 }
   0x8   :  { %25 = dma.hbm_to_vmem [thread:$0]  %s18_s25, 256, %s20_s29, [#allocation3], %s465_s26, %s465_s26, %s466_s27  }
   0x9   :  { %s47_s7 = sshll.u32 %s468_s0, 4  ;;  %s48_s7 = int_to_ptr.vmem [resolvable:$true] %s47_s7 }
   0xa   :  { %53 = dma.hbm_to_vmem [thread:$0]  %s46_s1, 2048, %s48_s7, [#allocation6], %s465_s26, %s465_s26, %s466_s27  }
   0xb   :  { %458 = dma.done.wait [#allocation3], 256  }
   0xc   :  { %459 = vsyncadd [#allocation3], 4294967040 }
   0xd   :  { %460 = dma.done.wait [#allocation6], 4096  }
   0xe   :  { %461 = vsyncadd [#allocation6], 4294963200  ;;  %v85_v0 = vld [vmem:[#allocation5 + $0x78] sm:$0xff]  ;;  %v84_v1 = vld [vmem:[#allocation5 + $0x70] sm:$0xff]  ;;  %s469_s10 = smov [#allocation8]   ;;  %s298_s14 = sshll.u32 %s560_s5, 4  ;;  %s299_s14 = int_to_ptr.hbm [resolvable:$true] %s298_s14 }
   0xf   :  { %90 = vmatpush.msra.mxu0 %v85_v0  ;;  %314 = vmatpush.msra.mxu2 %v85_v0  ;;  %v83_v2 = vld [vmem:[#allocation5 + $0x68] sm:$0xff]  ;;  %v82_v3 = vld [vmem:[#allocation5 + $0x60] sm:$0xff]  ;;  %v81_v4 = vld [vmem:[#allocation5 + $0x58] sm:$0xff]  ;;  %s296_s11 = sshll.u32 %s469_s10, 4  ;;  %s297_s11 = int_to_ptr.vmem [resolvable:$true] %s296_s11 }
  0x10   :  { %v80_v5 = vld [vmem:[#allocation5 + $0x50] sm:$0xff]  ;;  %v79_v6 = vld [vmem:[#allocation5 + $0x48] sm:$0xff]  ;;  %v78_v7 = vld [vmem:[#allocation5 + $0x40] sm:$0xff] }
  0x11   :  { %91 = vmatpush.msra.mxu0 %v84_v1  ;;  %315 = vmatpush.msra.mxu2 %v84_v1  ;;  %v77_v8 = vld [vmem:[#allocation5 + $0x38] sm:$0xff]  ;;  %v76_v9 = vld [vmem:[#allocation5 + $0x30] sm:$0xff]  ;;  %v75_v10 = vld [vmem:[#allocation5 + $0x28] sm:$0xff] }
  0x12   :  { %v74_v11 = vld [vmem:[#allocation5 + $0x20] sm:$0xff]  ;;  %v73_v12 = vld [vmem:[#allocation5 + $0x18] sm:$0xff]  ;;  %v72_v13 = vld [vmem:[#allocation5 + $0x10] sm:$0xff] }
  0x13   :  { %92 = vmatpush.msra.mxu0 %v83_v2  ;;  %316 = vmatpush.msra.mxu2 %v83_v2  ;;  %v71_v14 = vld [vmem:[#allocation5 + $0x8] sm:$0xff]  ;;  %v70_v15 = vld [vmem:[#allocation5] sm:$0xff]  ;;  %v68_v16 = vld [vmem:[#allocation2] sm:$0xff] }
  0x14   :  { %v69_v17 = vld [vmem:[#allocation2 + $0x8] sm:$0xff]  ;;  %v352_v18 = vld [vmem:[%s557_s2] ss:$0 sm:$0xff] }
  0x15   :  { %93 = vmatpush.msra.mxu0 %v82_v3  ;;  %317 = vmatpush.msra.mxu2 %v82_v3 }
  0x17   :  { %94 = vmatpush.msra.mxu0 %v81_v4  ;;  %318 = vmatpush.msra.mxu2 %v81_v4 }
  0x19   :  { %95 = vmatpush.msra.mxu0 %v80_v5  ;;  %319 = vmatpush.msra.mxu2 %v80_v5 }
  0x1b   :  { %96 = vmatpush.msra.mxu0 %v79_v6  ;;  %320 = vmatpush.msra.mxu2 %v79_v6 }
  0x1d   :  { %97 = vmatpush.msra.mxu0 %v78_v7  ;;  %321 = vmatpush.msra.mxu2 %v78_v7 }
  0x1f   :  { %98 = vmatpush.msra.mxu0 %v77_v8  ;;  %322 = vmatpush.msra.mxu2 %v77_v8 }
  0x21   :  { %99 = vmatpush.msra.mxu0 %v76_v9  ;;  %323 = vmatpush.msra.mxu2 %v76_v9 }
  0x23   :  { %100 = vmatpush.msra.mxu0 %v75_v10  ;;  %324 = vmatpush.msra.mxu2 %v75_v10 }
  0x25   :  { %101 = vmatpush.msra.mxu0 %v74_v11  ;;  %325 = vmatpush.msra.mxu2 %v74_v11 }
  0x27   :  { %102 = vmatpush.msra.mxu0 %v73_v12  ;;  %326 = vmatpush.msra.mxu2 %v73_v12 }
  0x29   :  { %103 = vmatpush.msra.mxu0 %v72_v13  ;;  %327 = vmatpush.msra.mxu2 %v72_v13 }
  0x2b   :  { %104 = vmatpush.msra.mxu0 %v71_v14  ;;  %328 = vmatpush.msra.mxu2 %v71_v14 }
  0x2d   :  { %105 = vmatpush.msra.mxu0 %v70_v15  ;;  %329 = vmatpush.msra.mxu2 %v70_v15 }
  0x2e   :  { %106 = vmatmul.f32.vlgmr.msra.gmra.mxu0 %v68_v16  ;;  %109 = vmatmul.f32.vlgmr.msra.gmra.mxu2 %v69_v17 }
  0xab   :  { %v107_v19 = vpop.f32.mrf.mxu0 }
  0xac   :  { %v521_v20 = vadd.f32 %v352_v18, %v107_v19 }
  0xae   :  { %v115_v21 = vmul.f32 0.70710677, %v521_v20 }
  0xb0   :  { %v117_v22 = vmul.f32 %v115_v21, %v115_v21 }
  0xb1   :  { %v110_v23 = vpop.f32.mrf.mxu2 }
  0xb2   :  { %v118_v24 = vmin.f32 %v117_v22, 16.0  ;;  %v524_v25 = vadd.f32 %v352_v18, %v110_v23 }
  0xb4   :  { %v119_v26 = vmul.f32 2.1237322e-06, %v118_v24  ;;  %v130_v27 = vmul.f32 3.8918573e-05, %v118_v24  ;;  %v527_v28 = vmul.f32 0.70710677, %v524_v25 }
  0xb6   :  { %v120_v29 = vadd.f32 0.00028619796, %v119_v26  ;;  %v131_v30 = vadd.f32 0.001143296, %v130_v27  ;;  %v157_v31 = vmul.f32 %v527_v28, %v527_v28 }
  0xb8   :  { %v121_v32 = vmul.f32 %v120_v29, %v118_v24  ;;  %v132_v33 = vmul.f32 %v131_v30, %v118_v24  ;;  %v158_v34 = vmin.f32 %v157_v31, 16.0  ;;  %v113_v29 = vmul.f32 0.5, %v521_v20 }
  0xba   :  { %v133_v35 = vadd.f32 0.014752088, %v132_v33  ;;  %v122_v36 = vadd.f32 0.0036580483, %v121_v32  ;;  %v159_v37 = vmul.f32 2.1237322e-06, %v158_v34 }
  0xbb   :  { %v170_v38 = vmul.f32 3.8918573e-05, %v158_v34 }
  0xbc   :  { %v134_v39 = vmul.f32 %v133_v35, %v118_v24  ;;  %v160_v40 = vadd.f32 0.00028619796, %v159_v37  ;;  %v123_v43 = vmul.f32 %v122_v36, %v118_v24  ;;  %v114_v37 = vmul.f32 0.5, %v524_v25  ;;  %v260_v25 = vld [vmem:[#allocation7 + $0x68] sm:$0xff] }
  0xbd   :  { %v171_v41 = vadd.f32 0.001143296, %v170_v38 }
  0xbe   :  { %v135_v42 = vadd.f32 0.112945676, %v134_v39  ;;  %v161_v44 = vmul.f32 %v160_v40, %v158_v34  ;;  %v124_v50 = vadd.f32 0.05243302, %v123_v43  ;;  %v262_v40 = vld [vmem:[#allocation7 + $0x78] sm:$0xff] }
  0xbf   :  { %v172_v45 = vmul.f32 %v171_v41, %v158_v34  ;;  %267 = vmatpush.msra.mxu1 %v262_v40  ;;  %330 = vmatpush.msra.mxu3 %v262_v40  ;;  %v261_v41 = vld [vmem:[#allocation7 + $0x70] sm:$0xff]  ;;  %v258_v43 = vld [vmem:[#allocation7 + $0x58] sm:$0xff] }
  0xc0   :  { %v136_v46 = vmul.f32 %v135_v42, %v118_v24  ;;  %v162_v49 = vadd.f32 0.0036580483, %v161_v44  ;;  %v125_v56 = vmul.f32 %v124_v50, %v118_v24  ;;  %v259_v42 = vld [vmem:[#allocation7 + $0x60] sm:$0xff]  ;;  %v257_v44 = vld [vmem:[#allocation7 + $0x50] sm:$0xff] }
  0xc1   :  { %v173_v47 = vadd.f32 0.014752088, %v172_v45  ;;  %268 = vmatpush.msra.mxu1 %v261_v41  ;;  %331 = vmatpush.msra.mxu3 %v261_v41  ;;  %v256_v45 = vld [vmem:[#allocation7 + $0x48] sm:$0xff]  ;;  %v251_v50 = vld [vmem:[#allocation7 + $0x20] sm:$0xff] }
  0xc2   :  { %v137_v48 = vadd.f32 0.4994258, %v136_v46  ;;  %v163_v55 = vmul.f32 %v162_v49, %v158_v34  ;;  %v126_v60 = vadd.f32 0.18741608, %v125_v56  ;;  %v255_v46 = vld [vmem:[#allocation7 + $0x40] sm:$0xff]  ;;  %v252_v49 = vld [vmem:[#allocation7 + $0x28] sm:$0xff] }
  0xc3   :  { %v174_v51 = vmul.f32 %v173_v47, %v158_v34  ;;  %269 = vmatpush.msra.mxu1 %v260_v25  ;;  %332 = vmatpush.msra.mxu3 %v260_v25  ;;  %v254_v47 = vld [vmem:[#allocation7 + $0x38] sm:$0xff] }
  0xc4   :  { %v138_v52 = vmul.f32 %v137_v48, %v118_v24  ;;  %v164_v59 = vadd.f32 0.05243302, %v163_v55  ;;  %v127_v1 = vmul.f32 %v126_v60, %v118_v24  ;;  %v253_v48 = vld [vmem:[#allocation7 + $0x30] sm:$0xff]  ;;  %v247_v55 = vld [vmem:[#allocation7] sm:$0xff] }
  0xc5   :  { %v175_v53 = vadd.f32 0.112945676, %v174_v51  ;;  %270 = vmatpush.msra.mxu1 %v259_v42  ;;  %333 = vmatpush.msra.mxu3 %v259_v42  ;;  %v250_v51 = vld [vmem:[#allocation7 + $0x18] sm:$0xff] }
  0xc6   :  { %v139_v54 = vadd.f32 1.0, %v138_v52  ;;  %v165_v0 = vmul.f32 %v164_v59, %v158_v34  ;;  %v128_v6 = vadd.f32 1.1283791, %v127_v1 }
  0xc7   :  { %v176_v57 = vmul.f32 %v175_v53, %v158_v34  ;;  %271 = vmatpush.msra.mxu1 %v258_v43  ;;  %334 = vmatpush.msra.mxu3 %v258_v43  ;;  %v249_v53 = vld [vmem:[#allocation7 + $0x10] sm:$0xff] }
  0xc8   :  { %354 = vrcp.f32 %v139_v54  ;;  %v151_v4 = vand.u32 2147483648, %v139_v54  ;;  %v166_v5 = vadd.f32 0.18741608, %v165_v0  ;;  %v149_v8 = vand.u32 2147483647, %v139_v54 }
  0xc9   :  { %v177_v58 = vadd.f32 0.4994258, %v176_v57  ;;  %vm145_vm1 = vweird.f32 %v139_v54  ;;  %v129_v14 = vmul.f32 %v128_v6, %v115_v21  ;;  %272 = vmatpush.msra.mxu1 %v257_v44  ;;  %335 = vmatpush.msra.mxu3 %v257_v44 }
  0xca   :  { %v152_v11 = vor.u32 1.1754944e-38, %v151_v4  ;;  %v167_v12 = vmul.f32 %v166_v5, %v158_v34  ;;  %vm150_vm3 = vcmp.eq.f32.partialorder %v149_v8, 8.507059e+37 }
  0xcb   :  { %v178_v61 = vmul.f32 %v177_v58, %v158_v34  ;;  %273 = vmatpush.msra.mxu1 %v256_v45  ;;  %336 = vmatpush.msra.mxu3 %v256_v45 }
  0xcc   :  { %v168_v22 = vadd.f32 1.1283791, %v167_v12 }
  0xcd   :  { %v179_v62 = vadd.f32 1.0, %v178_v61  ;;  %274 = vmatpush.msra.mxu1 %v255_v46  ;;  %337 = vmatpush.msra.mxu3 %v255_v46 }
  0xce   :  { %v355_v63 = vpop.eup %354  ;;  %v169_v21 = vmul.f32 %v168_v22, %v527_v28 }
  0xcf   :  { %v141_v2 = vmul.f32 %v355_v63, %v139_v54  ;;  %356 = vrcp.f32 %v179_v62  ;;  %vm146_vm0 = vweird.f32 %v355_v63  ;;  %v191_v19 = vand.u32 2147483648, %v179_v62  ;;  %275 = vmatpush.msra.mxu1 %v254_v47  ;;  %338 = vmatpush.msra.mxu3 %v254_v47  ;;  %v248_v54 = vld [vmem:[#allocation7 + $0x8] sm:$0xff] }
  0xd0   :  { %vm147_vm2 = vmor %vm145_vm1, %vm146_vm0  ;;  %v189_v24 = vand.u32 2147483647, %v179_v62  ;;  %vm185_vm5 = vweird.f32 %v179_v62 }
  0xd1   :  { %v142_v3 = vsub.f32 1.0, %v141_v2  ;;  %v192_v30 = vor.u32 1.1754944e-38, %v191_v19  ;;  %276 = vmatpush.msra.mxu1 %v253_v48  ;;  %339 = vmatpush.msra.mxu3 %v253_v48 }
  0xd2   :  { %vm190_vm7 = vcmp.eq.f32.partialorder %v189_v24, 8.507059e+37 }
  0xd3   :  { %v143_v7 = vmul.f32 %v355_v63, %v142_v3  ;;  %277 = vmatpush.msra.mxu1 %v252_v49  ;;  %340 = vmatpush.msra.mxu3 %v252_v49 }
  0xd5   :  { %v357_v9 = vpop.eup %356  ;;  %v144_v10 = vadd.f32 %v355_v63, %v143_v7  ;;  %278 = vmatpush.msra.mxu1 %v251_v50  ;;  %341 = vmatpush.msra.mxu3 %v251_v50 }
  0xd6   :  { %v181_v13 = vmul.f32 %v357_v9, %v179_v62  ;;  %vm186_vm4 = vweird.f32 %v357_v9 }
  0xd7   :  { %v148_v15 = vsel %vm147_vm2, %v355_v63, %v144_v10  ;;  %vm187_vm6 = vmor %vm185_vm5, %vm186_vm4  ;;  %279 = vmatpush.msra.mxu1 %v250_v51  ;;  %342 = vmatpush.msra.mxu3 %v250_v51 }
  0xd8   :  { %v153_v16 = vsel %vm150_vm3, %v152_v11, %v148_v15  ;;  %v182_v17 = vsub.f32 1.0, %v181_v13 }
  0xd9   :  { %v154_v18 = vmul.f32 %v153_v16, %v129_v14  ;;  %280 = vmatpush.msra.mxu1 %v249_v53  ;;  %343 = vmatpush.msra.mxu3 %v249_v53 }
  0xda   :  { %v183_v23 = vmul.f32 %v357_v9, %v182_v17 }
  0xdb   :  { %v312_v26 = vclamps-f32 %v154_v18, 1.0  ;;  %281 = vmatpush.msra.mxu1 %v248_v54  ;;  %344 = vmatpush.msra.mxu3 %v248_v54 }
  0xdc   :  { %v184_v27 = vadd.f32 %v357_v9, %v183_v23 }
  0xdd   :  { %v197_v31 = vadd.f32 1.0, %v312_v26  ;;  %282 = vmatpush.msra.mxu1 %v247_v55  ;;  %345 = vmatpush.msra.mxu3 %v247_v55 }
  0xde   :  { %v188_v32 = vsel %vm187_vm6, %v357_v9, %v184_v27 }
  0xdf   :  { %v193_v33 = vsel %vm190_vm7, %v192_v30, %v188_v32  ;;  %v533_v34 = vmul.f32 %v197_v31, %v113_v29  ;;  %v353_v29 = vld [vmem:[%s559_s4] ss:$0 sm:$0xff] }
  0xe0   :  { %v194_v35 = vmul.f32 %v193_v33, %v169_v21 }
  0xe1   :  { %201 = vadd.xlane.f32.xlu1 %v533_v34  ;;  %v207_v20 = vmul.f32 %v533_v34, %v533_v34 }
  0xe2   :  { %v313_v36 = vclamps-f32 %v194_v35, 1.0 }
  0xe4   :  { %v198_v38 = vadd.f32 1.0, %v313_v36 }
  0xe6   :  { %v537_v39 = vmul.f32 %v198_v38, %v114_v37 }
  0xe8   :  { %203 = vadd.xlane.f32.xlu0 %v537_v39  ;;  %v208_v28 = vmul.f32 %v537_v39, %v537_v39 }
  0xe9   :  { %209 = vadd.xlane.f32.xlu1 %v207_v20 }
  0xf0   :  { %211 = vadd.xlane.f32.xlu0 %v208_v28 }
 0x154   :  { %v202_v52 = vpop.xlane.xlu1 %201 }
 0x155   :  { %v205_v56 = vmul.f32 0.03125, %v202_v52 }
 0x157   :  { %v215_v59 = vmul.f32 %v205_v56, %v205_v56  ;;  %v221_v15 = vsub.f32 %v533_v34, %v205_v56 }
 0x15b   :  { %v204_v57 = vpop.xlane.xlu0 %203 }
 0x15c   :  { %v210_v58 = vpop.xlane.xlu1 %209  ;;  %v206_v62 = vmul.f32 0.03125, %v204_v57 }
 0x15d   :  { %v213_v60 = vmul.f32 0.03125, %v210_v58 }
 0x15e   :  { %v216_v2 = vmul.f32 %v206_v62, %v206_v62  ;;  %v222_v24 = vsub.f32 %v537_v39, %v206_v62 }
 0x15f   :  { %v217_v61 = vsub.f32 %v213_v60, %v215_v59 }
 0x161   :  { %v219_v63 = vmax.f32 %v217_v61, 0.0 }
 0x163   :  { %v223_v0 = vadd.f32 1e-12, %v219_v63  ;;  %v212_v1 = vpop.xlane.xlu0 %211 }
 0x164   :  { %v214_v3 = vmul.f32 0.03125, %v212_v1 }
 0x165   :  { %358 = vrsqrt.f32 %v223_v0  ;;  %vm231_vm9 = vweird.f32 %v223_v0 }
 0x166   :  { %v218_v4 = vsub.f32 %v214_v3, %v216_v2 }
 0x168   :  { %v220_v5 = vmax.f32 %v218_v4, 0.0 }
 0x16a   :  { %v224_v6 = vadd.f32 1e-12, %v220_v5 }
 0x16b   :  { %v359_v7 = vpop.eup %358 }
 0x16c   :  { %v226_v8 = vmul.f32 %v359_v7, %v223_v0  ;;  %360 = vrsqrt.f32 %v224_v6  ;;  %vm232_vm8 = vweird.f32 %v359_v7  ;;  %vm241_vm12 = vweird.f32 %v224_v6 }
 0x16d   :  { %vm233_vm10 = vmor %vm231_vm9, %vm232_vm8 }
 0x16e   :  { %v227_v9 = vmul.f32 %v359_v7, %v226_v8 }
 0x170   :  { %v228_v10 = vmul.f32 0.5, %v227_v9 }
 0x172   :  { %v361_v11 = vpop.eup %360  ;;  %v229_v12 = vsub.f32 1.5, %v228_v10 }
 0x173   :  { %v236_v13 = vmul.f32 %v361_v11, %v224_v6  ;;  %vm242_vm11 = vweird.f32 %v361_v11 }
 0x174   :  { %v230_v14 = vmul.f32 %v359_v7, %v229_v12  ;;  %vm243_vm13 = vmor %vm241_vm12, %vm242_vm11 }
 0x175   :  { %v237_v16 = vmul.f32 %v361_v11, %v236_v13 }
 0x176   :  { %v234_v17 = vsel %vm233_vm10, %v359_v7, %v230_v14 }
 0x177   :  { %v245_v18 = vmul.f32 %v234_v17, %v221_v15  ;;  %v238_v19 = vmul.f32 0.5, %v237_v16 }
 0x179   :  { %283 = vmatmul.f32.vlgmr.msra.gmra.mxu1 %v245_v18  ;;  %v239_v22 = vsub.f32 1.5, %v238_v19 }
 0x17b   :  { %v240_v23 = vmul.f32 %v361_v11, %v239_v22 }
 0x17d   :  { %v244_v26 = vsel %vm243_vm13, %v361_v11, %v240_v23 }
 0x17e   :  { %v246_v27 = vmul.f32 %v244_v26, %v222_v24 }
 0x180   :  { %286 = vmatmul.f32.vlgmr.msra.gmra.mxu3 %v246_v27 }
 0x1f6   :  { %v284_v30 = vpop.f32.mrf.mxu1 }
 0x1f7   :  { %v285_v31 = vadd.f32 %v353_v29, %v284_v30 }
 0x1f9   :  { %290 = vst [vmem:[#allocation8] sm:$0xff] %v285_v31 }
 0x203   :  { %v287_v21 = vpop.f32.mrf.mxu3 }
 0x204   :  { %v288_v32 = vadd.f32 %v353_v29, %v287_v21 }
 0x206   :  { %291 = vst [vmem:[#allocation8 + $0x8] sm:$0xff] %v288_v32 }
 0x207   :  { %304 = dma.vmem_to_hbm [thread:$0]  %s297_s11, 256, %s299_s14, [#allocation4], %s465_s26, %s465_s26, %s466_s27  }
 0x208   :  { %462 = dma.done.wait [#allocation4], 256  }
 0x209   :  { %463 = vsyncadd [#allocation4], 4294967040 }
 0x20a   :  { %309 = vsyncpa [#allocation3], 1 }
 0x20b   :  { %310 = vsyncpa [#allocation6], 1 }
 0x20c   :  { %311 = vsyncpa [#allocation4], 1 }

</bundles_post_ra>
